<compile_context>
chip_gen: v7x
topology: tpu7x:2x2x1
jax: 0.10.0
libtpu: 0.0.40
codegen_flags: <defaults>
</compile_context>

<pallas_src>
import functools

import jax
import jax.numpy as jnp
from jax.experimental import pallas as pl
from jax.experimental.pallas import tpu as pltpu

HIDDEN = 150       # logical hidden width of the PyTorch model
HIDDEN_PAD = 256   # lane-aligned padded hidden width (zero padding)


def _round_up(x, m):
    return (x + m - 1) // m * m


def _has_bf16_eup():
    """bf16 transcendentals exist on v6e / v7x; v5e (and older) are f32-only."""
    try:
        kind = jax.devices()[0].device_kind.lower()
    except Exception:
        return False
    return ("v6" in kind) or ("v7" in kind)


def _choose_tile(B, tile_batch):
    """Pick a batch tile (multiple of 128) that amortizes per-step overhead,
    keeps >= 2 grid steps when B permits (dual-TC v7x), and minimizes
    padded-row waste for awkward B."""
    chunks = _round_up(B, 128) // 128
    max_chunks = max(tile_batch // 128, 1)
    num_tiles = pl.cdiv(chunks, max_chunks)
    if num_tiles == 1 and chunks >= 2:
        num_tiles = 2                      # give both v7x TensorCores work
    per_tile = pl.cdiv(chunks, num_tiles)
    num_tiles = pl.cdiv(chunks, per_tile)  # recompute (can only shrink)
    return per_tile * 128, num_tiles


def prepare_params(params, compute_dtype=jnp.bfloat16):
    """Pad & cast weights ONCE (hoisted out of the forward per perf review).

    params: w1(feats,150), b1(1,150), w2(150,150), b2(1,150), w3(150,1), b3(1,1)
    (weights already laid out (in, out))."""
    cdt, f32 = compute_dtype, jnp.float32
    feats = params["w1"].shape[0]
    w1 = jnp.zeros((feats, HIDDEN_PAD), cdt).at[:, :HIDDEN].set(
        params["w1"].astype(cdt))
    b1 = jnp.zeros((1, HIDDEN_PAD), f32).at[:, :HIDDEN].set(
        params["b1"].reshape(1, HIDDEN).astype(f32))
    w2 = jnp.zeros((HIDDEN_PAD, HIDDEN_PAD), cdt).at[:HIDDEN, :HIDDEN].set(
        params["w2"].astype(cdt))
    b2 = jnp.zeros((1, HIDDEN_PAD), f32).at[:, :HIDDEN].set(
        params["b2"].reshape(1, HIDDEN).astype(f32))
    w3 = jnp.zeros((1, HIDDEN_PAD), f32).at[:, :HIDDEN].set(
        params["w3"].reshape(1, HIDDEN).astype(f32))
    b3 = params["b3"].reshape(1).astype(f32)            # scalar, goes to SMEM
    return {"w1": w1, "b1": b1, "w2": w2, "b2": b2, "w3": w3, "b3": b3}


def _naive_mlp_kernel(x_ref, w1_ref, b1_ref, w2_ref, b2_ref, w3_ref, b3_ref,
                      o_ref, *, activation: str, scale: float, act_dtype):
    """One batch tile: (tb, feats) -> lane-dense (1, 1, tb) output block."""
    cdt = w1_ref.dtype                    # matmul operand dtype (bf16 or f32)
    f32 = jnp.float32

    # Hoist small resident operands once (JAX does not CSE broadcasts).
    b1 = b1_ref[...]                      # (1, HP) f32
    b2 = b2_ref[...]                      # (1, HP) f32
    w3 = w3_ref[...]                      # (1, HP) f32
    b3 = b3_ref[0]                        # f32 scalar from SMEM

    # Cast x to the matmul dtype in-kernel (cheaper than a wrapper-side copy).
    x = x_ref[...].astype(cdt)            # (tb, feats)

    # Two real matmuls on the MXU; f32 accumulation.  tanh runs in bf16 on
    # v6e/v7x (bf16 EUP, binding unit) and in f32 on v5e.
    pre1 = jnp.dot(x, w1_ref[...], preferred_element_type=f32) + b1   # (tb, HP)
    h1 = jnp.tanh(pre1.astype(act_dtype)).astype(cdt)                 # (tb, HP)
    pre2 = jnp.dot(h1, w2_ref[...], preferred_element_type=f32) + b2  # (tb, HP)
    h2 = jnp.tanh(pre2.astype(act_dtype))                             # (tb, HP)

    # Third Linear has a single output feature: VPU multiply + XLU lane
    # reduction instead of a 1-wide MXU pass.  Keep the reduce in f32.
    z = jnp.sum(h2.astype(f32) * w3, axis=-1)      # (tb,) f32
    z = z[None, None, :] + b3                      # (1, 1, tb) lane-dense

    if activation == "sig":
        y = jax.nn.sigmoid(z)
    else:
        y = jnp.tanh(z)

    o_ref[...] = (scale * y).astype(o_ref.dtype)


def naive_model_forward(x, prepared, *, activation: str, scale: float,
                        tile_batch: int = 1024, act_dtype=None):
    """x: (B, feats) in its native dtype.  prepared: output of prepare_params."""
    assert activation in ("sig", "tanh")
    B, feats = x.shape
    assert prepared["w1"].shape[0] == feats

    if act_dtype is None:
        act_dtype = (jnp.bfloat16
                     if (prepared["w1"].dtype == jnp.bfloat16 and _has_bf16_eup())
                     else jnp.float32)

    tb, num_tiles = _choose_tile(B, tile_batch)
    b_pad = num_tiles * tb
    xp = x if b_pad == B else jnp.pad(x, ((0, b_pad - B), (0, 0)))

    kernel = functools.partial(_naive_mlp_kernel, activation=activation,
                               scale=float(scale), act_dtype=act_dtype)

    def full_spec(arr):
        nd = arr.ndim
        return pl.BlockSpec(arr.shape, lambda i, _nd=nd: (0,) * _nd)

    out3d = pl.pallas_call(
        kernel,
        out_shape=jax.ShapeDtypeStruct((num_tiles, 1, tb), jnp.float32),
        grid_spec=pltpu.PrefetchScalarGridSpec(
            num_scalar_prefetch=0,
            grid=(num_tiles,),
            in_specs=[
                # last dim == full array dim -> exempt from the 128 rule,
                # so no feats padding of x is needed.
                pl.BlockSpec((tb, feats), lambda i: (i, 0)),
                full_spec(prepared["w1"]), full_spec(prepared["b1"]),
                full_spec(prepared["w2"]), full_spec(prepared["b2"]),
                full_spec(prepared["w3"]),
                pl.BlockSpec(memory_space=pltpu.MemorySpace.SMEM),   # b3 scalar
            ],
            out_specs=pl.BlockSpec((1, 1, tb), lambda i: (i, 0, 0)),
        ),
        compiler_params=pltpu.CompilerParams(
            dimension_semantics=("parallel",)),       # megacore-shardable
    )(xp, prepared["w1"], prepared["b1"], prepared["w2"], prepared["b2"],
      prepared["w3"], prepared["b3"])

    # (num_tiles, 1, tb) -> (b_pad, 1); drop padded rows.
    return out3d.reshape(b_pad, 1)[:B]


def init_params(key, feats):
    """Deterministic init mimicking PyTorch Linear default U(-1/sqrt(fan_in), +)."""
    ks = jax.random.split(key, 6)

    def lin(kw, kb, fan_in, fan_out):
        bound = 1.0 / jnp.sqrt(jnp.float32(fan_in))
        w = jax.random.uniform(kw, (fan_in, fan_out), jnp.float32, -bound, bound)
        b = jax.random.uniform(kb, (1, fan_out), jnp.float32, -bound, bound)
        return w, b

    w1, b1 = lin(ks[0], ks[1], feats, HIDDEN)
    w2, b2 = lin(ks[2], ks[3], HIDDEN, HIDDEN)
    w3, b3 = lin(ks[4], ks[5], HIDDEN, 1)
    return {"w1": w1, "b1": b1, "w2": w2, "b2": b2, "w3": w3, "b3": b3}


def reference_forward(x, p, activation, scale):
    h1 = jnp.tanh(x @ p["w1"] + p["b1"])
    h2 = jnp.tanh(h1 @ p["w2"] + p["b2"])
    z = h2 @ p["w3"] + p["b3"]
    y = jax.nn.sigmoid(z) if activation == "sig" else jnp.tanh(z)
    return scale * y


if __name__ == "__main__":
    key = jax.random.PRNGKey(0)
    k_param, k_x = jax.random.split(key)

    feats = 32
    batch = 8
    scale = 2.5

    params = init_params(k_param, feats)
    x = jax.random.normal(k_x, (batch, feats), dtype=jnp.float32)

    # Exact path: f32 matmul operands + f32 activations (tight tolerance).
    prep_f32 = prepare_params(params, compute_dtype=jnp.float32)
    for activation in ("sig", "tanh"):
        out = jax.block_until_ready(
            naive_model_forward(x, prep_f32, activation=activation,
                                scale=scale, act_dtype=jnp.float32))
        ref = reference_forward(x, params, activation, scale)
        assert out.shape == (batch, 1)
        assert jnp.allclose(out, ref, atol=1e-5, rtol=1e-5), (
            f"f32 mismatch ({activation}): {jnp.max(jnp.abs(out - ref))}")

    # Fast path (default): bf16 matmul operands on every generation, bf16 tanh
    # where the EUP supports it (v6e/v7x).  Quantized -> looser tolerance.
    prep_bf16 = prepare_params(params)          # bf16 by default
    out_fast = jax.block_until_ready(
        naive_model_forward(x, prep_bf16, activation="sig", scale=scale))
    ref = reference_forward(x, params, "sig", scale)
    assert out_fast.shape == (batch, 1)
    assert jnp.allclose(out_fast, ref, atol=1e-1, rtol=1e-1), (
        f"bf16 mismatch: {jnp.max(jnp.abs(out_fast - ref))}")

    # TODO(synk): midbn/lastbn BatchNorm1d layers are declared in __init__ but
    # never used in forward(), so they are intentionally not implemented.
    print("KERNEL_OK")
</pallas_src>

<mosaic_0001>
module attributes {stable_mosaic.version = 11 : i64} {
  func.func @_naive_mlp_kernel(%arg0: i32, %arg1: memref<128x32xf32, #tpu.memory_space<vmem>>, %arg2: memref<32x256xf32, #tpu.memory_space<vmem>>, %arg3: memref<1x256xf32, #tpu.memory_space<vmem>>, %arg4: memref<256x256xf32, #tpu.memory_space<vmem>>, %arg5: memref<1x256xf32, #tpu.memory_space<vmem>>, %arg6: memref<1x256xf32, #tpu.memory_space<vmem>>, %arg7: memref<1xf32, #tpu.memory_space<smem>>, %arg8: memref<1x1x128xf32, #tpu.memory_space<vmem>>) attributes {dimension_semantics = [#tpu.dimension_semantics<parallel>], iteration_bounds = array<i64: 1>, scalar_prefetch = 0 : i64, scratch_operands = 0 : i64, tpu.core_type = #tpu.core_type<tc>, window_params = [{transform_indices = @transform_0, window_bounds = array<i64: 128, 32>}, {pipeline_mode = #tpu.pipeline_mode<synchronous>, transform_indices = @transform_1, window_bounds = array<i64: 32, 256>}, {pipeline_mode = #tpu.pipeline_mode<synchronous>, transform_indices = @transform_2, window_bounds = array<i64: 1, 256>}, {pipeline_mode = #tpu.pipeline_mode<synchronous>, transform_indices = @transform_3, window_bounds = array<i64: 256, 256>}, {pipeline_mode = #tpu.pipeline_mode<synchronous>, transform_indices = @transform_4, window_bounds = array<i64: 1, 256>}, {pipeline_mode = #tpu.pipeline_mode<synchronous>, transform_indices = @transform_5, window_bounds = array<i64: 1, 256>}, {transform_indices = @transform_6, window_bounds = array<i64: 1>}, {transform_indices = @transform_7, window_bounds = array<i64: 1, 1, 128>}]} {
    %c0 = arith.constant 0 : index
    %c0_0 = arith.constant 0 : index
    %0 = vector.load %arg3[%c0, %c0_0] : memref<1x256xf32, #tpu.memory_space<vmem>>, vector<1x256xf32>
    %c0_1 = arith.constant 0 : index
    %c0_2 = arith.constant 0 : index
    %1 = vector.load %arg5[%c0_1, %c0_2] : memref<1x256xf32, #tpu.memory_space<vmem>>, vector<1x256xf32>
    %c0_3 = arith.constant 0 : index
    %c0_4 = arith.constant 0 : index
    %2 = vector.load %arg6[%c0_3, %c0_4] : memref<1x256xf32, #tpu.memory_space<vmem>>, vector<1x256xf32>
    %c0_5 = arith.constant 0 : index
    %3 = memref.load %arg7[%c0_5] : memref<1xf32, #tpu.memory_space<smem>>
    %c0_6 = arith.constant 0 : index
    %c0_7 = arith.constant 0 : index
    %4 = vector.load %arg1[%c0_6, %c0_7] : memref<128x32xf32, #tpu.memory_space<vmem>>, vector<128x32xf32>
    %c0_8 = arith.constant 0 : index
    %c0_9 = arith.constant 0 : index
    %5 = vector.load %arg2[%c0_8, %c0_9] : memref<32x256xf32, #tpu.memory_space<vmem>>, vector<32x256xf32>
    %cst = arith.constant dense<0.000000e+00> : vector<128x256xf32>
    %6 = tpu.matmul %4, %5, %cst {dimension_numbers = #tpu.dot_dimension_numbers<[1], [0], [0], [1], [0, 0, 1, 1], [], []>} : vector<128x32xf32>, vector<32x256xf32>, vector<128x256xf32> -> vector<128x256xf32>
    %7 = vector.broadcast %0 : vector<1x256xf32> to vector<128x256xf32>
    %8 = arith.addf %6, %7 : vector<128x256xf32>
    %9 = math.tanh %8 : vector<128x256xf32>
    %c0_10 = arith.constant 0 : index
    %c0_11 = arith.constant 0 : index
    %10 = vector.load %arg4[%c0_10, %c0_11] : memref<256x256xf32, #tpu.memory_space<vmem>>, vector<256x256xf32>
    %cst_12 = arith.constant dense<0.000000e+00> : vector<128x256xf32>
    %11 = tpu.matmul %9, %10, %cst_12 {dimension_numbers = #tpu.dot_dimension_numbers<[1], [0], [0], [1], [0, 0, 1, 1], [], []>} : vector<128x256xf32>, vector<256x256xf32>, vector<128x256xf32> -> vector<128x256xf32>
    %12 = vector.broadcast %1 : vector<1x256xf32> to vector<128x256xf32>
    %13 = arith.addf %11, %12 : vector<128x256xf32>
    %14 = math.tanh %13 : vector<128x256xf32>
    %15 = vector.broadcast %2 : vector<1x256xf32> to vector<128x256xf32>
    %16 = arith.mulf %14, %15 : vector<128x256xf32>
    %cst_13 = arith.constant dense<0.000000e+00> : vector<128xf32>
    %17 = vector.multi_reduction <add>, %16, %cst_13 [1] : vector<128x256xf32> to vector<128xf32>
    %18 = vector.shape_cast %17 : vector<128xf32> to vector<1x1x128xf32>
    %19 = vector.broadcast %3 : f32 to vector<1x1x128xf32>
    %20 = arith.addf %18, %19 : vector<1x1x128xf32>
    %21 = arith.negf %20 : vector<1x1x128xf32>
    %22 = math.exp %21 : vector<1x1x128xf32>
    %cst_14 = arith.constant 1.000000e+00 : f32
    %23 = vector.broadcast %cst_14 : f32 to vector<1x1x128xf32>
    %24 = arith.addf %23, %22 : vector<1x1x128xf32>
    %25 = arith.divf %23, %24 : vector<1x1x128xf32>
    %cst_15 = arith.constant 2.500000e+00 : f32
    %26 = vector.broadcast %cst_15 : f32 to vector<1x1x128xf32>
    %27 = arith.mulf %26, %25 : vector<1x1x128xf32>
    %c0_16 = arith.constant 0 : index
    %c0_17 = arith.constant 0 : index
    %c0_18 = arith.constant 0 : index
    %28 = vector.load %arg8[%c0_16, %c0_17, %c0_18] : memref<1x1x128xf32, #tpu.memory_space<vmem>>, vector<1x1x128xf32>
    tpu.vector_store %arg8[%c0_16, %c0_17, %c0_18], %27 {strides = array<i32>} : memref<1x1x128xf32, #tpu.memory_space<vmem>>, vector<1x1x128xf32>,
    return
  }
  func.func @transform_0(%arg0: i32) -> (i32, i32) {
    %c0_i32 = arith.constant 0 : i32
    %c0_i32_0 = arith.constant 0 : i32
    return %arg0, %c0_i32 : i32, i32
  }
  func.func @transform_1(%arg0: i32) -> (i32, i32) {
    %c0_i32 = arith.constant 0 : i32
    %c0_i32_0 = arith.constant 0 : i32
    %c0_i32_1 = arith.constant 0 : i32
    return %c0_i32, %c0_i32_0 : i32, i32
  }
  func.func @transform_2(%arg0: i32) -> (i32, i32) {
    %c0_i32 = arith.constant 0 : i32
    %c0_i32_0 = arith.constant 0 : i32
    %c0_i32_1 = arith.constant 0 : i32
    return %c0_i32, %c0_i32_0 : i32, i32
  }
  func.func @transform_3(%arg0: i32) -> (i32, i32) {
    %c0_i32 = arith.constant 0 : i32
    %c0_i32_0 = arith.constant 0 : i32
    %c0_i32_1 = arith.constant 0 : i32
    return %c0_i32, %c0_i32_0 : i32, i32
  }
  func.func @transform_4(%arg0: i32) -> (i32, i32) {
    %c0_i32 = arith.constant 0 : i32
    %c0_i32_0 = arith.constant 0 : i32
    %c0_i32_1 = arith.constant 0 : i32
    return %c0_i32, %c0_i32_0 : i32, i32
  }
  func.func @transform_5(%arg0: i32) -> (i32, i32) {
    %c0_i32 = arith.constant 0 : i32
    %c0_i32_0 = arith.constant 0 : i32
    %c0_i32_1 = arith.constant 0 : i32
    return %c0_i32, %c0_i32_0 : i32, i32
  }
  func.func @transform_6(%arg0: i32) -> i32 {
    %c0_i32 = arith.constant 0 : i32
    %c0_i32_0 = arith.constant 0 : i32
    return %c0_i32 : i32
  }
  func.func @transform_7(%arg0: i32) -> (i32, i32, i32) {
    %c0_i32 = arith.constant 0 : i32
    %c0_i32_0 = arith.constant 0 : i32
    %c0_i32_1 = arith.constant 0 : i32
    return %arg0, %c0_i32, %c0_i32_0 : i32, i32, i32
  }
}

</mosaic_0001>

<bundles_post_ra>
// kernel: tpu_custom_call.1
= control target key start
LH: loop header
LB: loop body
LE: loop exit
PB: predicated region body
PF: predicated region fallthrough
CT: control target
= control target key end

     0   :  { %13 = vsyncpa [#allocation4], 0  ;;  %s1711_s0 = inlined_call_operand.vmem [shape: f32[128,32], index: 0, kind: input, shape index: {}]   ;;  %s1712_s1 = inlined_call_operand.vmem [shape: f32[32,256], index: 1, kind: input, shape index: {}]   ;;  %s1713_s2 = inlined_call_operand.vmem [shape: f32[1,256], index: 2, kind: input, shape index: {}]   ;;  %s1714_s3 = inlined_call_operand.hbm [shape: f32[256,256], index: 3, kind: input, shape index: {}]   ;;  %s1715_s4 = inlined_call_operand.vmem [shape: f32[1,256], index: 4, kind: input, shape index: {}]   ;;  %s1716_s5 = inlined_call_operand.vmem [shape: f32[1,256], index: 5, kind: input, shape index: {}]   ;;  %s1717_s6 = inlined_call_operand.<no memory space> [shape: f32[1], index: 6, kind: input, shape index: {}]   ;;  %s1718_s7 = inlined_call_operand.hbm [shape: f32[1,1,128], index: 7, kind: output, shape index: {}]  }
   0x1   :  { %14 = vsyncpa [#allocation5], 0  ;;  %s1336_s24 = smov [#allocation3]   ;;  %s1288_s28 = scalar_lea.hbm %s1714_s3, 8192 }
   0x2   :  { %s26_s25 = sshll.u32 %s1336_s24, 4  ;;  %p1289_p0 = scmp.ne.s32.totalorder %s1714_s3, %s1288_s28  ;;  %s27_s25 = int_to_ptr.vmem [resolvable:$true] %s26_s25 }
   0x3   :  { %p1292_p1 = scmp.lt.u32.totalorder %s1288_s28, %s1714_s3 }
   0x5   :  { %p1294_p2 = pnand %p1292_p1, %p1289_p0 }
   0x7   :  { %1297 = shalt.err (!%p1294_p2)
}
   0x8   :  { %s1298_s10 = scalar_lea.vmem %s27_s25, 8192  ;;  %p1303_p4 = scmp.lt.s32.totalorder %s27_s25, %s27_s25 }
   0x9   :  { %p1299_p3 = scmp.ne.s32.totalorder %s27_s25, %s1298_s10  ;;  %p1304_p5 = scmp.lt.s32.totalorder %s1298_s10, %s1298_s10 }
   0xb   :  { %p1305_p6 = por %p1304_p5, %p1303_p4 }
   0xd   :  { %p1306_p7 = pnand %p1305_p6, %p1299_p3 }
   0xf   :  { %1309 = shalt.err (!%p1306_p7)
}
  0x10   :  { %s1337_s11 = smov 256   ;;  %s1338_s12 = smov 16  }
  0x11   :  { %32 = dma.hbm_to_vmem [thread:$0]  %s1714_s3, 8192, %s27_s25, [#allocation4], %s1337_s11, %s1337_s11, %s1338_s12  }
  0x12   :  { %1332 = dma.done.wait [#allocation4], 8192  }
  0x13   :  { %1333 = vsyncadd [#allocation4], 4294959104  ;;  %v1339_v0 = vmov 0.0   ;;  %v63_v1 = vld [vmem:[%s1712_s1 + $0x8] sm:$0xff]  ;;  %v65_v2 = vld [vmem:[%s1712_s1 + $0x18] sm:$0xff]  ;;  %vm81_vm0 = vcmask 261120  }
  0x14   :  { %194 = vmatprep.mubr.f32.mxu0 %v1339_v0  ;;  %v62_v3 = vld [vmem:[%s1712_s1] sm:$0xff]  ;;  %v987_v4 = vpack.c.bf16 %v65_v2, %v63_v1  ;;  %v64_v5 = vld [vmem:[%s1712_s1 + $0x10] sm:$0xff]  ;;  %v67_v6 = vld [vmem:[%s1712_s1 + $0x28] sm:$0xff]  ;;  %vm838_vm1 = vcmask 130112   ;;  %vm845_vm2 = vcmask 195712   ;;  %vm852_vm3 = vcmask 261312  }
  0x15   :  { %v69_v7 = vld [vmem:[%s1712_s1 + $0x38] sm:$0xff]  ;;  %v989_v8 = vpack.c.bf16 %v64_v5, %v62_v3  ;;  %v66_v10 = vld [vmem:[%s1712_s1 + $0x20] sm:$0xff]  ;;  %v68_v11 = vld [vmem:[%s1712_s1 + $0x30] sm:$0xff]  ;;  %vm859_vm4 = vcmask 326912   ;;  %vm866_vm5 = vcmask 392512   ;;  %vm873_vm6 = vcmask 458112  }
  0x16   :  { %v991_v9 = vpack.c.bf16 %v69_v7, %v67_v6  ;;  %988 = vmatprep.subr.bf16.mxu0 %v987_v4  ;;  %v993_v12 = vpack.c.bf16 %v68_v11, %v66_v10  ;;  %v46_v13 = vld [vmem:[%s1711_s0] sm:$0xff]  ;;  %v324_v14 = vld [vmem:[#allocation3 + $0x8] sm:$0xff]  ;;  %v326_v15 = vld [vmem:[#allocation3 + $0x18] sm:$0xff]  ;;  %vm880_vm7 = vcmask 523712   ;;  %vm887_vm8 = vcmask 589312  }
  0x17   :  { %990 = vmatpush1.bf16.msra.mxu0 %v989_v8  ;;  %v323_v16 = vld [vmem:[#allocation3] sm:$0xff]  ;;  %v995_v17 = vpack.c.bf16 %v326_v15, %v324_v14  ;;  %v325_v18 = vld [vmem:[#allocation3 + $0x10] sm:$0xff]  ;;  %v328_v19 = vld [vmem:[#allocation3 + $0x28] sm:$0xff]  ;;  %vm894_vm9 = vcmask 654912   ;;  %vm901_vm10 = vcmask 720512   ;;  %vm908_vm11 = vcmask 786112  }
  0x18   :  { %992 = vmatprep.subr.bf16.mxu0 %v991_v9  ;;  %v330_v20 = vld [vmem:[#allocation3 + $0x38] sm:$0xff]  ;;  %v997_v21 = vpack.c.bf16 %v325_v18, %v323_v16  ;;  %v327_v23 = vld [vmem:[#allocation3 + $0x20] sm:$0xff]  ;;  %v329_v24 = vld [vmem:[#allocation3 + $0x30] sm:$0xff]  ;;  %vm915_vm12 = vcmask 851712   ;;  %vm922_vm13 = vcmask 917312   ;;  %vm929_vm14 = vcmask 982912  }
  0x19   :  { %v999_v22 = vpack.c.bf16 %v330_v20, %v328_v19  ;;  %v332_v25 = vld [vmem:[#allocation3 + $0x48] sm:$0xff]  ;;  %v334_v26 = vld [vmem:[#allocation3 + $0x58] sm:$0xff]  ;;  %v1001_v28 = vpack.c.bf16 %v329_v24, %v327_v23  ;;  %v331_v30 = vld [vmem:[#allocation3 + $0x40] sm:$0xff]  ;;  %1059 = vmatprep.subr.bf16.mxu1 %v995_v17  ;;  %vm936_vm15 = vcmask 1048512  }
  0x1a   :  { %v47_v27 = vld [vmem:[%s1711_s0 + $0x8] sm:$0xff]  ;;  %v1003_v29 = vpack.c.bf16 %v334_v26, %v332_v25  ;;  %v333_v31 = vld [vmem:[#allocation3 + $0x50] sm:$0xff]  ;;  %v338_v33 = vld [vmem:[#allocation3 + $0x78] sm:$0xff]  ;;  %1075 = vmatpush1.bf16.msra.mxu1 %v997_v21 }
  0x1b   :  { %994 = vmatpush1.bf16.msra.mxu0 %v993_v12  ;;  %v336_v32 = vld [vmem:[#allocation3 + $0x68] sm:$0xff]  ;;  %1060 = vmatprep.subr.bf16.mxu1 %v999_v22  ;;  %v48_v34 = vld [vmem:[%s1711_s0 + $0x10] sm:$0xff]  ;;  %v1005_v35 = vpack.c.bf16 %v333_v31, %v331_v30  ;;  %v335_v37 = vld [vmem:[#allocation3 + $0x60] sm:$0xff] }
  0x1c   :  { %996 = vmatprep.subr.bf16.mxu0 %v995_v17  ;;  %v1007_v36 = vpack.c.bf16 %v338_v33, %v336_v32  ;;  %v337_v38 = vld [vmem:[#allocation3 + $0x70] sm:$0xff]  ;;  %v340_v39 = vld [vmem:[#allocation3 + $0x88] sm:$0xff]  ;;  %v342_v40 = vld [vmem:[#allocation3 + $0x98] sm:$0xff] }
  0x1d   :  { %v49_v41 = vld [vmem:[%s1711_s0 + $0x18] sm:$0xff]  ;;  %v1009_v42 = vpack.c.bf16 %v337_v38, %v335_v37  ;;  %v1011_v43 = vpack.c.bf16 %v342_v40, %v340_v39  ;;  %v339_v44 = vld [vmem:[#allocation3 + $0x80] sm:$0xff]  ;;  %v341_v45 = vld [vmem:[#allocation3 + $0x90] sm:$0xff] }
  0x1e   :  { %955 = vmatmul.mubr.msk.f32.vlgmr.msra.gmra.mrb[0].mxu0 %vm81_vm0, %v46_v13  ;;  %1076 = vmatpush1.bf16.msra.mxu1 %v1001_v28  ;;  %v344_v46 = vld [vmem:[#allocation3 + $0xa8] sm:$0xff]  ;;  %v346_v47 = vld [vmem:[#allocation3 + $0xb8] sm:$0xff]  ;;  %v50_v48 = vld [vmem:[%s1711_s0 + $0x20] sm:$0xff]  ;;  %v1013_v49 = vpack.c.bf16 %v341_v45, %v339_v44 }
  0x1f   :  { %200 = vmatprep.mubr.f32.mxu0 %v1339_v0  ;;  %998 = vmatpush1.bf16.msra.mxu0 %v997_v21  ;;  %v1015_v50 = vpack.c.bf16 %v346_v47, %v344_v46  ;;  %v343_v51 = vld [vmem:[#allocation3 + $0xa0] sm:$0xff]  ;;  %v345_v52 = vld [vmem:[#allocation3 + $0xb0] sm:$0xff]  ;;  %v348_v53 = vld [vmem:[#allocation3 + $0xc8] sm:$0xff] }
  0x20   :  { %1000 = vmatprep.subr.bf16.mxu0 %v999_v22  ;;  %1061 = vmatprep.subr.bf16.mxu1 %v1003_v29  ;;  %v350_v54 = vld [vmem:[#allocation3 + $0xd8] sm:$0xff]  ;;  %v51_v55 = vld [vmem:[%s1711_s0 + $0x28] sm:$0xff]  ;;  %v1017_v56 = vpack.c.bf16 %v345_v52, %v343_v51  ;;  %v347_v58 = vld [vmem:[#allocation3 + $0xc0] sm:$0xff] }
  0x21   :  { %v1019_v57 = vpack.c.bf16 %v350_v54, %v348_v53  ;;  %v349_v59 = vld [vmem:[#allocation3 + $0xd0] sm:$0xff]  ;;  %v352_v60 = vld [vmem:[#allocation3 + $0xe8] sm:$0xff]  ;;  %v354_v61 = vld [vmem:[#allocation3 + $0xf8] sm:$0xff] }
  0x22   :  { %956 = vmatmul.mubr.msk.f32.gmra.mrb[2].mxu0 %vm81_vm0, %v47_v27  ;;  %1077 = vmatpush1.bf16.msra.mxu1 %v1005_v35  ;;  %v52_v62 = vld [vmem:[%s1711_s0 + $0x30] sm:$0xff]  ;;  %v1021_v63 = vpack.c.bf16 %v349_v59, %v347_v58  ;;  %v1023_v1 = vpack.c.bf16 %v354_v61, %v352_v60  ;;  %v351_v2 = vld [vmem:[#allocation3 + $0xe0] sm:$0xff]  ;;  %v356_v4 = vld [vmem:[#allocation3 + $0x108] sm:$0xff]  ;;  %v71_v61 = vlaneseq }
  0x23   :  { %206 = vmatprep.mubr.f32.mxu0 %v1339_v0  ;;  %1002 = vmatpush1.bf16.msra.mxu0 %v1001_v28  ;;  %v353_v3 = vld [vmem:[#allocation3 + $0xf0] sm:$0xff]  ;;  %v358_v5 = vld [vmem:[#allocation3 + $0x118] sm:$0xff]  ;;  %v355_v9 = vld [vmem:[#allocation3 + $0x100] sm:$0xff] }
  0x24   :  { %1004 = vmatprep.subr.bf16.mxu0 %v1003_v29  ;;  %1062 = vmatprep.subr.bf16.mxu1 %v1007_v36  ;;  %v53_v6 = vld [vmem:[%s1711_s0 + $0x38] sm:$0xff]  ;;  %v1025_v7 = vpack.c.bf16 %v353_v3, %v351_v2  ;;  %v1027_v8 = vpack.c.bf16 %v358_v5, %v356_v4  ;;  %v357_v10 = vld [vmem:[#allocation3 + $0x110] sm:$0xff]  ;;  %v360_v11 = vld [vmem:[#allocation3 + $0x128] sm:$0xff] }
  0x25   :  { %v362_v12 = vld [vmem:[#allocation3 + $0x138] sm:$0xff]  ;;  %v54_v13 = vld [vmem:[%s1711_s0 + $0x40] sm:$0xff]  ;;  %v1029_v14 = vpack.c.bf16 %v357_v10, %v355_v9  ;;  %v361_v17 = vld [vmem:[#allocation3 + $0x130] sm:$0xff] }
  0x26   :  { %957 = vmatmul.mubr.msk.f32.gmra.mrb[4].mxu0 %vm81_vm0, %v48_v34  ;;  %1078 = vmatpush1.bf16.msra.mxu1 %v1009_v42  ;;  %v1031_v15 = vpack.c.bf16 %v362_v12, %v360_v11  ;;  %v359_v16 = vld [vmem:[#allocation3 + $0x120] sm:$0xff]  ;;  %v364_v18 = vld [vmem:[#allocation3 + $0x148] sm:$0xff]  ;;  %v366_v19 = vld [vmem:[#allocation3 + $0x158] sm:$0xff] }
  0x27   :  { %212 = vmatprep.mubr.f32.mxu0 %v1339_v0  ;;  %1006 = vmatpush1.bf16.msra.mxu0 %v1005_v35  ;;  %v55_v20 = vld [vmem:[%s1711_s0 + $0x48] sm:$0xff]  ;;  %v1033_v21 = vpack.c.bf16 %v361_v17, %v359_v16  ;;  %v1035_v22 = vpack.c.bf16 %v366_v19, %v364_v18  ;;  %v363_v23 = vld [vmem:[#allocation3 + $0x140] sm:$0xff]  ;;  %v365_v24 = vld [vmem:[#allocation3 + $0x150] sm:$0xff] }
  0x28   :  { %1008 = vmatprep.subr.bf16.mxu0 %v1007_v36  ;;  %1063 = vmatprep.subr.bf16.mxu1 %v1011_v43  ;;  %v368_v25 = vld [vmem:[#allocation3 + $0x168] sm:$0xff]  ;;  %v370_v26 = vld [vmem:[#allocation3 + $0x178] sm:$0xff]  ;;  %v56_v27 = vld [vmem:[%s1711_s0 + $0x50] sm:$0xff]  ;;  %v1037_v28 = vpack.c.bf16 %v365_v24, %v363_v23 }
  0x29   :  { %v1039_v29 = vpack.c.bf16 %v370_v26, %v368_v25  ;;  %v367_v30 = vld [vmem:[#allocation3 + $0x160] sm:$0xff]  ;;  %v369_v31 = vld [vmem:[#allocation3 + $0x170] sm:$0xff]  ;;  %v57_v32 = vld [vmem:[%s1711_s0 + $0x58] sm:$0xff] }
  0x2a   :  { %958 = vmatmul.mubr.msk.f32.gmra.mrb[6].mxu0 %vm81_vm0, %v49_v41  ;;  %1079 = vmatpush1.bf16.msra.mxu1 %v1013_v49  ;;  %v1041_v33 = vpack.c.bf16 %v369_v31, %v367_v30  ;;  %v58_v34 = vld [vmem:[%s1711_s0 + $0x60] sm:$0xff]  ;;  %v59_v35 = vld [vmem:[%s1711_s0 + $0x68] sm:$0xff]  ;;  %v60_v36 = vld [vmem:[%s1711_s0 + $0x70] sm:$0xff] }
  0x2b   :  { %218 = vmatprep.mubr.f32.mxu0 %v1339_v0  ;;  %1010 = vmatpush1.bf16.msra.mxu0 %v1009_v42  ;;  %v61_v37 = vld [vmem:[%s1711_s0 + $0x78] sm:$0xff]  ;;  %v372_v38 = vld [vmem:[#allocation3 + $0x188] sm:$0xff]  ;;  %v371_v41 = vld [vmem:[#allocation3 + $0x180] sm:$0xff] }
  0x2c   :  { %1012 = vmatprep.subr.bf16.mxu0 %v1011_v43  ;;  %1064 = vmatprep.subr.bf16.mxu1 %v1015_v50  ;;  %v374_v39 = vld [vmem:[#allocation3 + $0x198] sm:$0xff]  ;;  %v373_v42 = vld [vmem:[#allocation3 + $0x190] sm:$0xff]  ;;  %v376_v44 = vld [vmem:[#allocation3 + $0x1a8] sm:$0xff] }
  0x2d   :  { %v1043_v40 = vpack.c.bf16 %v374_v39, %v372_v38  ;;  %v1045_v43 = vpack.c.bf16 %v373_v42, %v371_v41  ;;  %v378_v45 = vld [vmem:[#allocation3 + $0x1b8] sm:$0xff]  ;;  %v377_v47 = vld [vmem:[#allocation3 + $0x1b0] sm:$0xff]  ;;  %v379_v52 = vld [vmem:[#allocation3 + $0x1c0] sm:$0xff] }
  0x2e   :  { %959 = vmatmul.mubr.msk.f32.gmra.mrb[8].mxu0 %vm81_vm0, %v50_v48  ;;  %1080 = vmatpush1.bf16.msra.mxu1 %v1017_v56  ;;  %v1047_v46 = vpack.c.bf16 %v378_v45, %v376_v44  ;;  %v381_v53 = vld [vmem:[#allocation3 + $0x1d0] sm:$0xff]  ;;  %v383_v58 = vld [vmem:[#allocation3 + $0x1e0] sm:$0xff] }
  0x2f   :  { %224 = vmatprep.mubr.f32.mxu0 %v1339_v0  ;;  %1014 = vmatpush1.bf16.msra.mxu0 %v1013_v49  ;;  %v380_v49 = vld [vmem:[#allocation3 + $0x1c8] sm:$0xff]  ;;  %v1053_v54 = vpack.c.bf16 %v381_v53, %v379_v52  ;;  %v385_v59 = vld [vmem:[#allocation3 + $0x1f0] sm:$0xff] }
  0x30   :  { %1016 = vmatprep.subr.bf16.mxu0 %v1015_v50  ;;  %1065 = vmatprep.subr.bf16.mxu1 %v1019_v57  ;;  %v382_v50 = vld [vmem:[#allocation3 + $0x1d8] sm:$0xff]  ;;  %v1057_v60 = vpack.c.bf16 %v385_v59, %v383_v58 }
  0x31   :  { %v1051_v51 = vpack.c.bf16 %v382_v50, %v380_v49 }
  0x32   :  { %960 = vmatmul.mubr.msk.f32.gmra.mrb[10].mxu0 %vm81_vm0, %v51_v55  ;;  %1081 = vmatpush1.bf16.msra.mxu1 %v1021_v63  ;;  %v384_v55 = vld [vmem:[#allocation3 + $0x1e8] sm:$0xff] }
  0x33   :  { %230 = vmatprep.mubr.f32.mxu0 %v1339_v0  ;;  %1018 = vmatpush1.bf16.msra.mxu0 %v1017_v56  ;;  %v386_v56 = vld [vmem:[#allocation3 + $0x1f8] sm:$0xff] }
  0x34   :  { %1020 = vmatprep.subr.bf16.mxu0 %v1019_v57  ;;  %1066 = vmatprep.subr.bf16.mxu1 %v1023_v1  ;;  %v1055_v57 = vpack.c.bf16 %v386_v56, %v384_v55 }
  0x36   :  { %961 = vmatmul.mubr.msk.f32.gmra.mrb[12].mxu0 %vm81_vm0, %v52_v62  ;;  %1082 = vmatpush1.bf16.msra.mxu1 %v1025_v7  ;;  %v1498_v62 = vshrl.u32 %v71_v61, 7 }
  0x37   :  { %236 = vmatprep.mubr.f32.mxu0 %v1339_v0  ;;  %1022 = vmatpush1.bf16.msra.mxu0 %v1021_v63 }
  0x38   :  { %1024 = vmatprep.subr.bf16.mxu0 %v1023_v1  ;;  %1067 = vmatprep.subr.bf16.mxu1 %v1027_v8  ;;  %v1501_v63 = vsub.s32 0, %v1498_v62  ;;  %v42_v1 = vld [vmem:[%s1713_s2] sm:$0x3]  ;;  %v1507_v2 = vsub.s32 1, %v1498_v62 }
  0x3a   :  { %962 = vmatmul.mubr.msk.f32.gmra.mrb[14].mxu0 %vm81_vm0, %v53_v6  ;;  %1083 = vmatpush1.bf16.msra.mxu1 %v1029_v14  ;;  %v1510_v3 = vrot.slane %v42_v1, %v1501_v63  ;;  %v1513_v4 = vrot.slane %v42_v1, %v1507_v2 }
  0x3b   :  { %242 = vmatprep.mubr.f32.mxu0 %v1339_v0  ;;  %1026 = vmatpush1.bf16.msra.mxu0 %v1025_v7 }
  0x3c   :  { %1028 = vmatprep.subr.bf16.mxu0 %v1027_v8  ;;  %1068 = vmatprep.subr.bf16.mxu1 %v1031_v15 }
  0x3e   :  { %963 = vmatmul.mubr.msk.f32.gmra.mrb[16].mxu0 %vm81_vm0, %v54_v13  ;;  %1084 = vmatpush1.bf16.msra.mxu1 %v1033_v21 }
  0x3f   :  { %248 = vmatprep.mubr.f32.mxu0 %v1339_v0  ;;  %1030 = vmatpush1.bf16.msra.mxu0 %v1029_v14 }
  0x40   :  { %1032 = vmatprep.subr.bf16.mxu0 %v1031_v15  ;;  %1069 = vmatprep.subr.bf16.mxu1 %v1035_v22 }
  0x42   :  { %964 = vmatmul.mubr.msk.f32.gmra.mrb[18].mxu0 %vm81_vm0, %v55_v20  ;;  %1085 = vmatpush1.bf16.msra.mxu1 %v1037_v28 }
  0x43   :  { %254 = vmatprep.mubr.f32.mxu0 %v1339_v0  ;;  %1034 = vmatpush1.bf16.msra.mxu0 %v1033_v21 }
  0x44   :  { %1036 = vmatprep.subr.bf16.mxu0 %v1035_v22  ;;  %1070 = vmatprep.subr.bf16.mxu1 %v1039_v29 }
  0x46   :  { %965 = vmatmul.mubr.msk.f32.gmra.mrb[20].mxu0 %vm81_vm0, %v56_v27  ;;  %1086 = vmatpush1.bf16.msra.mxu1 %v1041_v33 }
  0x47   :  { %260 = vmatprep.mubr.f32.mxu0 %v1339_v0  ;;  %1038 = vmatpush1.bf16.msra.mxu0 %v1037_v28 }
  0x48   :  { %1040 = vmatprep.subr.bf16.mxu0 %v1039_v29  ;;  %1071 = vmatprep.subr.bf16.mxu1 %v1043_v40 }
  0x4a   :  { %966 = vmatmul.mubr.msk.f32.gmra.mrb[22].mxu0 %vm81_vm0, %v57_v32  ;;  %1087 = vmatpush1.bf16.msra.mxu1 %v1045_v43 }
  0x4b   :  { %266 = vmatprep.mubr.f32.mxu0 %v1339_v0  ;;  %1042 = vmatpush1.bf16.msra.mxu0 %v1041_v33 }
  0x4c   :  { %1044 = vmatprep.subr.bf16.mxu0 %v1043_v40  ;;  %1072 = vmatprep.subr.bf16.mxu1 %v1047_v46 }
  0x4e   :  { %967 = vmatmul.mubr.msk.f32.gmra.mrb[24].mxu0 %vm81_vm0, %v58_v34 }
  0x4f   :  { %272 = vmatprep.mubr.f32.mxu0 %v1339_v0  ;;  %1046 = vmatpush1.bf16.msra.mxu0 %v1045_v43 }
  0x50   :  { %1048 = vmatprep.subr.bf16.mxu0 %v1047_v46 }
  0x52   :  { %968 = vmatmul.mubr.msk.f32.gmra.mrb[26].mxu0 %vm81_vm0, %v59_v35 }
  0x53   :  { %278 = vmatprep.mubr.f32.mxu0 %v1339_v0 }
  0x56   :  { %969 = vmatmul.mubr.msk.f32.gmra.mrb[28].mxu0 %vm81_vm0, %v60_v36 }
  0x57   :  { %284 = vmatprep.mubr.f32.mxu0 %v1339_v0  ;;  %v375_v0 = vld [vmem:[#allocation3 + $0x1a0] sm:$0xff] }
  0x58   :  { %v1049_v48 = vpack.c.bf16 %v377_v47, %v375_v0 }
  0x5a   :  { %970 = vmatmul.mubr.msk.f32.gmra.mrb[30].mxu0 %vm81_vm0, %v61_v37  ;;  %1088 = vmatpush1.bf16.msra.mxu1 %v1049_v48 }
  0x5b   :  { %1050 = vmatpush1.bf16.msra.mxu0 %v1049_v48  ;;  %1073 = vmatprep.subr.bf16.mxu1 %v1051_v51 }
  0x5c   :  { %1052 = vmatprep.subr.bf16.mxu0 %v1051_v51 }
  0x5e   :  { %1089 = vmatpush1.bf16.msra.mxu1 %v1053_v54 }
  0x5f   :  { %1054 = vmatpush1.bf16.msra.mxu0 %v1053_v54  ;;  %1074 = vmatprep.subr.bf16.mxu1 %v1055_v57 }
  0x60   :  { %1056 = vmatprep.subr.bf16.mxu0 %v1055_v57 }
  0x62   :  { %1090 = vmatpush1.bf16.msra.mxu1 %v1057_v60 }
  0x63   :  { %1058 = vmatpush1.bf16.msra.mxu0 %v1057_v60 }
  0xf1   :  { %v196_v5 = vpop.f32.mrb[0].mxu0 }
  0xf2   :  { %v197_v6 = vadd.f32 %v196_v5, %v1510_v3  ;;  %v198_v7 = vpop.f32.mrb[1].mxu0 }
  0xf3   :  { %v199_v8 = vadd.f32 %v198_v7, %v1513_v4 }
  0xf5   :  { %1096 = vtanh.f32 %v199_v8  ;;  %v202_v9 = vpop.f32.mrb[2].mxu0 }
  0xf6   :  { %1098 = vtanh.f32 %v197_v6  ;;  %v203_v10 = vadd.f32 %v202_v9, %v1510_v3  ;;  %v204_v11 = vpop.f32.mrb[3].mxu0 }
  0xf7   :  { %v205_v12 = vadd.f32 %v204_v11, %v1513_v4 }
  0xf9   :  { %1100 = vtanh.f32 %v205_v12  ;;  %v208_v13 = vpop.f32.mrb[4].mxu0 }
  0xfa   :  { %1102 = vtanh.f32 %v203_v10  ;;  %v209_v14 = vadd.f32 %v208_v13, %v1510_v3  ;;  %v210_v15 = vpop.f32.mrb[5].mxu0 }
  0xfb   :  { %v211_v16 = vadd.f32 %v210_v15, %v1513_v4 }
  0xfd   :  { %1104 = vtanh.f32 %v211_v16  ;;  %v214_v17 = vpop.f32.mrb[6].mxu0 }
  0xfe   :  { %1106 = vtanh.f32 %v209_v14  ;;  %v215_v18 = vadd.f32 %v214_v17, %v1510_v3  ;;  %v216_v19 = vpop.f32.mrb[7].mxu0 }
  0xff   :  { %v1097_v20 = vpop.eup %1096  ;;  %v217_v21 = vadd.f32 %v216_v19, %v1513_v4 }
 0x100   :  { %v1099_v22 = vpop.eup %1098  ;;  %462 = vmatprep.mubr.f32.mxu0 %v1097_v20 }
 0x101   :  { %1108 = vtanh.f32 %v217_v21  ;;  %v220_v23 = vpop.f32.mrb[8].mxu0  ;;  %463 = vmatmul.mubr.f32.vlgmr.msra.gmra.mrb[32].mxu0 %v1099_v22 }
 0x102   :  { %1110 = vtanh.f32 %v215_v18  ;;  %v221_v24 = vadd.f32 %v220_v23, %v1510_v3  ;;  %v222_v25 = vpop.f32.mrb[9].mxu0 }
 0x103   :  { %v1101_v26 = vpop.eup %1100  ;;  %v223_v27 = vadd.f32 %v222_v25, %v1513_v4 }
 0x104   :  { %v1103_v28 = vpop.eup %1102  ;;  %468 = vmatprep.mubr.f32.mxu0 %v1101_v26 }
 0x105   :  { %1112 = vtanh.f32 %v223_v27  ;;  %v226_v29 = vpop.f32.mrb[10].mxu0  ;;  %469 = vmatmul.mubr.f32.gmra.mrb[34].mxu0 %v1103_v28 }
 0x106   :  { %1114 = vtanh.f32 %v221_v24  ;;  %v227_v30 = vadd.f32 %v226_v29, %v1510_v3  ;;  %v228_v31 = vpop.f32.mrb[11].mxu0 }
 0x107   :  { %v1105_v32 = vpop.eup %1104  ;;  %v229_v33 = vadd.f32 %v228_v31, %v1513_v4 }
 0x108   :  { %v1107_v34 = vpop.eup %1106  ;;  %474 = vmatprep.mubr.f32.mxu0 %v1105_v32 }
 0x109   :  { %1116 = vtanh.f32 %v229_v33  ;;  %v232_v35 = vpop.f32.mrb[12].mxu0  ;;  %475 = vmatmul.mubr.f32.gmra.mrb[36].mxu0 %v1107_v34 }
 0x10a   :  { %1118 = vtanh.f32 %v227_v30  ;;  %v233_v36 = vadd.f32 %v232_v35, %v1510_v3  ;;  %v234_v37 = vpop.f32.mrb[13].mxu0 }
 0x10b   :  { %v1109_v38 = vpop.eup %1108  ;;  %v235_v39 = vadd.f32 %v234_v37, %v1513_v4 }
 0x10c   :  { %v1111_v40 = vpop.eup %1110  ;;  %480 = vmatprep.mubr.f32.mxu0 %v1109_v38 }
 0x10d   :  { %1120 = vtanh.f32 %v235_v39  ;;  %v238_v41 = vpop.f32.mrb[14].mxu0  ;;  %481 = vmatmul.mubr.f32.gmra.mrb[38].mxu0 %v1111_v40 }
 0x10e   :  { %1122 = vtanh.f32 %v233_v36  ;;  %v239_v42 = vadd.f32 %v238_v41, %v1510_v3  ;;  %v240_v43 = vpop.f32.mrb[15].mxu0 }
 0x10f   :  { %v1113_v44 = vpop.eup %1112  ;;  %v241_v45 = vadd.f32 %v240_v43, %v1513_v4 }
 0x110   :  { %v1115_v46 = vpop.eup %1114  ;;  %486 = vmatprep.mubr.f32.mxu0 %v1113_v44 }
 0x111   :  { %1124 = vtanh.f32 %v241_v45  ;;  %v244_v0 = vpop.f32.mrb[16].mxu0  ;;  %487 = vmatmul.mubr.f32.gmra.mrb[40].mxu0 %v1115_v46 }
 0x112   :  { %1126 = vtanh.f32 %v239_v42  ;;  %v245_v47 = vadd.f32 %v244_v0, %v1510_v3  ;;  %v246_v48 = vpop.f32.mrb[17].mxu0 }
 0x113   :  { %v1117_v49 = vpop.eup %1116  ;;  %v247_v50 = vadd.f32 %v246_v48, %v1513_v4 }
 0x114   :  { %v1119_v51 = vpop.eup %1118  ;;  %492 = vmatprep.mubr.f32.mxu0 %v1117_v49 }
 0x115   :  { %1128 = vtanh.f32 %v247_v50  ;;  %v250_v52 = vpop.f32.mrb[18].mxu0  ;;  %493 = vmatmul.mubr.f32.gmra.mrb[42].mxu0 %v1119_v51  ;;  %v44_v51 = vld [vmem:[%s1716_s5] sm:$0x3] }
 0x116   :  { %1130 = vtanh.f32 %v245_v47  ;;  %v251_v53 = vadd.f32 %v250_v52, %v1510_v3  ;;  %v252_v54 = vpop.f32.mrb[19].mxu0 }
 0x117   :  { %v1121_v55 = vpop.eup %1120  ;;  %v253_v56 = vadd.f32 %v252_v54, %v1513_v4 }
 0x118   :  { %v1123_v57 = vpop.eup %1122  ;;  %498 = vmatprep.mubr.f32.mxu0 %v1121_v55 }
 0x119   :  { %1132 = vtanh.f32 %v253_v56  ;;  %v256_v58 = vpop.f32.mrb[20].mxu0  ;;  %499 = vmatmul.mubr.f32.gmra.mrb[44].mxu0 %v1123_v57  ;;  %v1566_v56 = vrot.slane %v44_v51, %v1501_v63  ;;  %v1569_v57 = vrot.slane %v44_v51, %v1507_v2 }
 0x11a   :  { %1134 = vtanh.f32 %v251_v53  ;;  %v257_v59 = vadd.f32 %v256_v58, %v1510_v3  ;;  %v258_v60 = vpop.f32.mrb[21].mxu0 }
 0x11b   :  { %v1125_v1 = vpop.eup %1124  ;;  %v259_v5 = vadd.f32 %v258_v60, %v1513_v4 }
 0x11c   :  { %v1127_v6 = vpop.eup %1126  ;;  %504 = vmatprep.mubr.f32.mxu1 %v1125_v1 }
 0x11d   :  { %1136 = vtanh.f32 %v259_v5  ;;  %v262_v7 = vpop.f32.mrb[22].mxu0  ;;  %505 = vmatmul.mubr.f32.vlgmr.msra.gmra.mrb[0].mxu1 %v1127_v6 }
 0x11e   :  { %1138 = vtanh.f32 %v257_v59  ;;  %v263_v8 = vadd.f32 %v262_v7, %v1510_v3  ;;  %v264_v9 = vpop.f32.mrb[23].mxu0 }
 0x11f   :  { %v1129_v10 = vpop.eup %1128  ;;  %v265_v11 = vadd.f32 %v264_v9, %v1513_v4 }
 0x120   :  { %v1131_v12 = vpop.eup %1130  ;;  %510 = vmatprep.mubr.f32.mxu1 %v1129_v10 }
 0x121   :  { %1140 = vtanh.f32 %v265_v11  ;;  %v268_v13 = vpop.f32.mrb[24].mxu0  ;;  %511 = vmatmul.mubr.f32.gmra.mrb[2].mxu1 %v1131_v12 }
 0x122   :  { %1142 = vtanh.f32 %v263_v8  ;;  %v269_v14 = vadd.f32 %v268_v13, %v1510_v3  ;;  %v270_v15 = vpop.f32.mrb[25].mxu0 }
 0x123   :  { %v1133_v16 = vpop.eup %1132  ;;  %v271_v17 = vadd.f32 %v270_v15, %v1513_v4 }
 0x124   :  { %v1135_v18 = vpop.eup %1134  ;;  %516 = vmatprep.mubr.f32.mxu1 %v1133_v16 }
 0x125   :  { %1144 = vtanh.f32 %v271_v17  ;;  %v274_v19 = vpop.f32.mrb[26].mxu0  ;;  %517 = vmatmul.mubr.f32.gmra.mrb[4].mxu1 %v1135_v18 }
 0x126   :  { %1146 = vtanh.f32 %v269_v14  ;;  %v275_v20 = vadd.f32 %v274_v19, %v1510_v3  ;;  %v276_v21 = vpop.f32.mrb[27].mxu0 }
 0x127   :  { %v1137_v22 = vpop.eup %1136  ;;  %v277_v23 = vadd.f32 %v276_v21, %v1513_v4 }
 0x128   :  { %v1139_v24 = vpop.eup %1138  ;;  %522 = vmatprep.mubr.f32.mxu1 %v1137_v22 }
 0x129   :  { %1148 = vtanh.f32 %v277_v23  ;;  %v280_v25 = vpop.f32.mrb[28].mxu0  ;;  %523 = vmatmul.mubr.f32.gmra.mrb[6].mxu1 %v1139_v24 }
 0x12a   :  { %1150 = vtanh.f32 %v275_v20  ;;  %v281_v26 = vadd.f32 %v280_v25, %v1510_v3  ;;  %v282_v27 = vpop.f32.mrb[29].mxu0 }
 0x12b   :  { %v1141_v28 = vpop.eup %1140  ;;  %v283_v29 = vadd.f32 %v282_v27, %v1513_v4 }
 0x12c   :  { %v1143_v30 = vpop.eup %1142  ;;  %528 = vmatprep.mubr.f32.mxu1 %v1141_v28 }
 0x12d   :  { %1152 = vtanh.f32 %v283_v29  ;;  %v286_v31 = vpop.f32.mrb[30].mxu0  ;;  %529 = vmatmul.mubr.f32.gmra.mrb[8].mxu1 %v1143_v30 }
 0x12e   :  { %1154 = vtanh.f32 %v281_v26  ;;  %v287_v32 = vadd.f32 %v286_v31, %v1510_v3  ;;  %v288_v33 = vpop.f32.mrb[31].mxu0  ;;  %v43_v3 = vld [vmem:[%s1715_s4] sm:$0x3] }
 0x12f   :  { %v1145_v34 = vpop.eup %1144  ;;  %v289_v35 = vadd.f32 %v288_v33, %v1513_v4  ;;  %v1551_v4 = vrot.slane %v43_v3, %v1501_v63  ;;  %v1554_v43 = vrot.slane %v43_v3, %v1507_v2 }
 0x130   :  { %v1147_v36 = vpop.eup %1146  ;;  %534 = vmatprep.mubr.f32.mxu1 %v1145_v34 }
 0x131   :  { %1156 = vtanh.f32 %v289_v35  ;;  %535 = vmatmul.mubr.f32.gmra.mrb[10].mxu1 %v1147_v36 }
 0x132   :  { %1158 = vtanh.f32 %v287_v32 }
 0x133   :  { %v1149_v37 = vpop.eup %1148 }
 0x134   :  { %v1151_v38 = vpop.eup %1150  ;;  %540 = vmatprep.mubr.f32.mxu1 %v1149_v37 }
 0x135   :  { %541 = vmatmul.mubr.f32.gmra.mrb[12].mxu1 %v1151_v38 }
 0x137   :  { %v1153_v39 = vpop.eup %1152 }
 0x138   :  { %v1155_v40 = vpop.eup %1154  ;;  %546 = vmatprep.mubr.f32.mxu1 %v1153_v39 }
 0x139   :  { %547 = vmatmul.mubr.f32.gmra.mrb[14].mxu1 %v1155_v40 }
 0x13b   :  { %v1157_v41 = vpop.eup %1156 }
 0x13c   :  { %v1159_v42 = vpop.eup %1158  ;;  %552 = vmatprep.mubr.f32.mxu1 %v1157_v41 }
 0x13d   :  { %553 = vmatmul.mubr.f32.gmra.mrb[16].mxu1 %v1159_v42 }
 0x1d4   :  { %v464_v44 = vpop.f32.mrb[32].mxu0 }
 0x1d5   :  { %v465_v45 = vadd.f32 %v464_v44, %v1551_v4  ;;  %v466_v46 = vpop.f32.mrb[33].mxu0 }
 0x1d6   :  { %v467_v0 = vadd.f32 %v466_v46, %v1554_v43 }
 0x1d7   :  { %1160 = vtanh.f32 %v465_v45 }
 0x1d8   :  { %1162 = vtanh.f32 %v467_v0  ;;  %v470_v47 = vpop.f32.mrb[34].mxu0 }
 0x1d9   :  { %v471_v48 = vadd.f32 %v470_v47, %v1551_v4  ;;  %v472_v49 = vpop.f32.mrb[35].mxu0 }
 0x1da   :  { %v473_v50 = vadd.f32 %v472_v49, %v1554_v43 }
 0x1db   :  { %1164 = vtanh.f32 %v471_v48 }
 0x1dc   :  { %1166 = vtanh.f32 %v473_v50  ;;  %v476_v52 = vpop.f32.mrb[36].mxu0 }
 0x1dd   :  { %v477_v53 = vadd.f32 %v476_v52, %v1551_v4  ;;  %v478_v54 = vpop.f32.mrb[37].mxu0 }
 0x1de   :  { %v479_v55 = vadd.f32 %v478_v54, %v1554_v43 }
 0x1df   :  { %1168 = vtanh.f32 %v477_v53 }
 0x1e0   :  { %1170 = vtanh.f32 %v479_v55  ;;  %v482_v58 = vpop.f32.mrb[38].mxu0 }
 0x1e1   :  { %v1161_v59 = vpop.eup %1160  ;;  %v483_v60 = vadd.f32 %v482_v58, %v1551_v4  ;;  %v484_v1 = vpop.f32.mrb[39].mxu0 }
 0x1e2   :  { %v1163_v5 = vpop.eup %1162  ;;  %v485_v6 = vadd.f32 %v484_v1, %v1554_v43  ;;  %v602_v7 = vmul.f32 %v1161_v59, %v1566_v56 }
 0x1e3   :  { %1172 = vtanh.f32 %v483_v60  ;;  %v603_v8 = vmul.f32 %v1163_v5, %v1569_v57 }
 0x1e4   :  { %1174 = vtanh.f32 %v485_v6  ;;  %v488_v63 = vpop.f32.mrb[40].mxu0 }
 0x1e5   :  { %v1165_v9 = vpop.eup %1164  ;;  %v489_v2 = vadd.f32 %v488_v63, %v1551_v4  ;;  %v490_v10 = vpop.f32.mrb[41].mxu0  ;;  %v634_v11 = vadd.f32 %v603_v8, %v602_v7 }
 0x1e6   :  { %v1167_v12 = vpop.eup %1166  ;;  %v491_v13 = vadd.f32 %v490_v10, %v1554_v43  ;;  %v604_v14 = vmul.f32 %v1165_v9, %v1566_v56 }
 0x1e7   :  { %1176 = vtanh.f32 %v489_v2  ;;  %635 = vadd.xlane.f32.xlu0 %v634_v11  ;;  %v605_v15 = vmul.f32 %v1167_v12, %v1569_v57 }
 0x1e8   :  { %1178 = vtanh.f32 %v491_v13  ;;  %v494_v16 = vpop.f32.mrb[42].mxu0 }
 0x1e9   :  { %v1169_v17 = vpop.eup %1168  ;;  %v495_v18 = vadd.f32 %v494_v16, %v1551_v4  ;;  %v496_v19 = vpop.f32.mrb[43].mxu0  ;;  %v637_v20 = vadd.f32 %v605_v15, %v604_v14 }
 0x1ea   :  { %v1171_v21 = vpop.eup %1170  ;;  %v497_v22 = vadd.f32 %v496_v19, %v1554_v43  ;;  %v606_v23 = vmul.f32 %v1169_v17, %v1566_v56 }
 0x1eb   :  { %1180 = vtanh.f32 %v495_v18  ;;  %638 = vadd.xlane.f32.xlu0 %v637_v20  ;;  %v607_v24 = vmul.f32 %v1171_v21, %v1569_v57 }
 0x1ec   :  { %1182 = vtanh.f32 %v497_v22  ;;  %v500_v25 = vpop.f32.mrb[44].mxu0 }
 0x1ed   :  { %v1173_v26 = vpop.eup %1172  ;;  %v501_v27 = vadd.f32 %v500_v25, %v1551_v4  ;;  %v502_v28 = vpop.f32.mrb[45].mxu0  ;;  %v640_v29 = vadd.f32 %v607_v24, %v606_v23 }
 0x1ee   :  { %v1175_v30 = vpop.eup %1174  ;;  %v503_v31 = vadd.f32 %v502_v28, %v1554_v43  ;;  %v608_v32 = vmul.f32 %v1173_v26, %v1566_v56 }
 0x1ef   :  { %1184 = vtanh.f32 %v501_v27  ;;  %641 = vadd.xlane.f32.xlu1 %v640_v29  ;;  %v609_v33 = vmul.f32 %v1175_v30, %v1569_v57 }
 0x1f0   :  { %1186 = vtanh.f32 %v503_v31  ;;  %v506_v34 = vpop.f32.mrb[0].mxu1 }
 0x1f1   :  { %v1177_v35 = vpop.eup %1176  ;;  %v507_v36 = vadd.f32 %v506_v34, %v1551_v4  ;;  %v508_v37 = vpop.f32.mrb[1].mxu1  ;;  %v643_v38 = vadd.f32 %v609_v33, %v608_v32 }
 0x1f2   :  { %v1179_v39 = vpop.eup %1178  ;;  %v509_v40 = vadd.f32 %v508_v37, %v1554_v43  ;;  %v610_v41 = vmul.f32 %v1177_v35, %v1566_v56 }
 0x1f3   :  { %1188 = vtanh.f32 %v507_v36  ;;  %644 = vadd.xlane.f32.xlu1 %v643_v38  ;;  %v611_v42 = vmul.f32 %v1179_v39, %v1569_v57 }
 0x1f4   :  { %1190 = vtanh.f32 %v509_v40  ;;  %v512_v3 = vpop.f32.mrb[2].mxu1 }
 0x1f5   :  { %v1181_v44 = vpop.eup %1180  ;;  %v513_v45 = vadd.f32 %v512_v3, %v1551_v4  ;;  %v514_v46 = vpop.f32.mrb[3].mxu1  ;;  %v646_v0 = vadd.f32 %v611_v42, %v610_v41 }
 0x1f6   :  { %v1183_v47 = vpop.eup %1182  ;;  %v515_v48 = vadd.f32 %v514_v46, %v1554_v43  ;;  %v612_v49 = vmul.f32 %v1181_v44, %v1566_v56 }
 0x1f7   :  { %1192 = vtanh.f32 %v513_v45  ;;  %647 = vadd.xlane.f32.xlu0 %v646_v0  ;;  %v613_v50 = vmul.f32 %v1183_v47, %v1569_v57 }
 0x1f8   :  { %1194 = vtanh.f32 %v515_v48  ;;  %v518_v51 = vpop.f32.mrb[4].mxu1 }
 0x1f9   :  { %v1185_v52 = vpop.eup %1184  ;;  %v519_v53 = vadd.f32 %v518_v51, %v1551_v4  ;;  %v520_v54 = vpop.f32.mrb[5].mxu1  ;;  %v649_v55 = vadd.f32 %v613_v50, %v612_v49 }
 0x1fa   :  { %v1187_v58 = vpop.eup %1186  ;;  %v521_v59 = vadd.f32 %v520_v54, %v1554_v43  ;;  %v614_v60 = vmul.f32 %v1185_v52, %v1566_v56 }
 0x1fb   :  { %1196 = vtanh.f32 %v519_v53  ;;  %650 = vadd.xlane.f32.xlu1 %v649_v55  ;;  %v615_v1 = vmul.f32 %v1187_v58, %v1569_v57 }
 0x1fc   :  { %1198 = vtanh.f32 %v521_v59  ;;  %v524_v5 = vpop.f32.mrb[6].mxu1 }
 0x1fd   :  { %v1189_v6 = vpop.eup %1188  ;;  %v525_v7 = vadd.f32 %v524_v5, %v1551_v4  ;;  %v526_v8 = vpop.f32.mrb[7].mxu1  ;;  %v652_v63 = vadd.f32 %v615_v1, %v614_v60 }
 0x1fe   :  { %v1191_v9 = vpop.eup %1190  ;;  %v527_v2 = vadd.f32 %v526_v8, %v1554_v43  ;;  %v616_v10 = vmul.f32 %v1189_v6, %v1566_v56 }
 0x1ff   :  { %1200 = vtanh.f32 %v525_v7  ;;  %653 = vadd.xlane.f32.xlu0 %v652_v63  ;;  %v617_v11 = vmul.f32 %v1191_v9, %v1569_v57 }
 0x200   :  { %1202 = vtanh.f32 %v527_v2  ;;  %v530_v12 = vpop.f32.mrb[8].mxu1 }
 0x201   :  { %v1193_v13 = vpop.eup %1192  ;;  %v531_v14 = vadd.f32 %v530_v12, %v1551_v4  ;;  %v532_v15 = vpop.f32.mrb[9].mxu1  ;;  %v655_v16 = vadd.f32 %v617_v11, %v616_v10 }
 0x202   :  { %v1195_v17 = vpop.eup %1194  ;;  %v533_v18 = vadd.f32 %v532_v15, %v1554_v43  ;;  %v618_v19 = vmul.f32 %v1193_v13, %v1566_v56 }
 0x203   :  { %1204 = vtanh.f32 %v531_v14  ;;  %656 = vadd.xlane.f32.xlu1 %v655_v16  ;;  %v619_v20 = vmul.f32 %v1195_v17, %v1569_v57  ;;  %v1632_v16 = vstv %s1717_s6  ;;  %s1340_s6 = smov [#allocation6]  }
 0x204   :  { %1206 = vtanh.f32 %v533_v18  ;;  %v536_v21 = vpop.f32.mrb[10].mxu1  ;;  %s946_s17 = sshll.u32 %s1340_s6, 4  ;;  %s947_s17 = int_to_ptr.vmem [resolvable:$true] %s946_s17 }
 0x205   :  { %v1197_v22 = vpop.eup %1196  ;;  %v537_v23 = vadd.f32 %v536_v21, %v1551_v4  ;;  %v538_v24 = vpop.f32.mrb[11].mxu1  ;;  %v658_v25 = vadd.f32 %v619_v20, %v618_v19  ;;  %s1310_s18 = scalar_lea.vmem %s947_s17, 16  ;;  %s1314_s19 = scalar_lea.vmem %s947_s17, 32 }
 0x206   :  { %v1199_v26 = vpop.eup %1198  ;;  %v539_v27 = vadd.f32 %v538_v24, %v1554_v43  ;;  %v620_v28 = vmul.f32 %v1197_v22, %v1566_v56  ;;  %p1311_p8 = scmp.ne.s32.totalorder %s947_s17, %s1310_s18  ;;  %p1315_p9 = scmp.lt.s32.totalorder %s947_s17, %s947_s17 }
 0x207   :  { %1208 = vtanh.f32 %v537_v23  ;;  %659 = vadd.xlane.f32.xlu0 %v658_v25  ;;  %v621_v29 = vmul.f32 %v1199_v26, %v1569_v57  ;;  %p1316_p10 = scmp.lt.s32.totalorder %s1314_s19, %s1310_s18 }
 0x208   :  { %1210 = vtanh.f32 %v539_v27  ;;  %v542_v30 = vpop.f32.mrb[12].mxu1 }
 0x209   :  { %v1201_v31 = vpop.eup %1200  ;;  %v543_v32 = vadd.f32 %v542_v30, %v1551_v4  ;;  %v544_v33 = vpop.f32.mrb[13].mxu1  ;;  %v661_v34 = vadd.f32 %v621_v29, %v620_v28  ;;  %p1317_p11 = por %p1316_p10, %p1315_p9 }
 0x20a   :  { %v1203_v35 = vpop.eup %1202  ;;  %v545_v36 = vadd.f32 %v544_v33, %v1554_v43  ;;  %v622_v37 = vmul.f32 %v1201_v31, %v1566_v56 }
 0x20b   :  { %1212 = vtanh.f32 %v543_v32  ;;  %662 = vadd.xlane.f32.xlu1 %v661_v34  ;;  %v623_v38 = vmul.f32 %v1203_v35, %v1569_v57  ;;  %p1318_p12 = pnand %p1317_p11, %p1311_p8 }
 0x20c   :  { %1214 = vtanh.f32 %v545_v36  ;;  %v548_v39 = vpop.f32.mrb[14].mxu1 }
 0x20d   :  { %v1205_v40 = vpop.eup %1204  ;;  %v549_v41 = vadd.f32 %v548_v39, %v1551_v4  ;;  %v550_v42 = vpop.f32.mrb[15].mxu1  ;;  %v664_v3 = vadd.f32 %v623_v38, %v622_v37 }
 0x20e   :  { %v1207_v44 = vpop.eup %1206  ;;  %v551_v45 = vadd.f32 %v550_v42, %v1554_v43  ;;  %v624_v46 = vmul.f32 %v1205_v40, %v1566_v56 }
 0x20f   :  { %1216 = vtanh.f32 %v549_v41  ;;  %665 = vadd.xlane.f32.xlu0 %v664_v3  ;;  %v625_v0 = vmul.f32 %v1207_v44, %v1569_v57 }
 0x210   :  { %1218 = vtanh.f32 %v551_v45  ;;  %v554_v47 = vpop.f32.mrb[16].mxu1 }
 0x211   :  { %v1209_v48 = vpop.eup %1208  ;;  %v555_v49 = vadd.f32 %v554_v47, %v1551_v4  ;;  %v556_v50 = vpop.f32.mrb[17].mxu1  ;;  %v667_v51 = vadd.f32 %v625_v0, %v624_v46 }
 0x212   :  { %v1211_v52 = vpop.eup %1210  ;;  %v557_v53 = vadd.f32 %v556_v50, %v1554_v43  ;;  %v626_v54 = vmul.f32 %v1209_v48, %v1566_v56 }
 0x213   :  { %1220 = vtanh.f32 %v555_v49  ;;  %668 = vadd.xlane.f32.xlu1 %v667_v51  ;;  %v627_v55 = vmul.f32 %v1211_v52, %v1569_v57 }
 0x214   :  { %1222 = vtanh.f32 %v557_v53 }
 0x215   :  { %v1213_v58 = vpop.eup %1212  ;;  %v670_v59 = vadd.f32 %v627_v55, %v626_v54 }
 0x216   :  { %v1215_v60 = vpop.eup %1214  ;;  %v628_v1 = vmul.f32 %v1213_v58, %v1566_v56 }
 0x217   :  { %671 = vadd.xlane.f32.xlu0 %v670_v59  ;;  %v629_v4 = vmul.f32 %v1215_v60, %v1569_v57 }
 0x219   :  { %v1217_v5 = vpop.eup %1216  ;;  %v673_v6 = vadd.f32 %v629_v4, %v628_v1 }
 0x21a   :  { %v1219_v7 = vpop.eup %1218  ;;  %v630_v43 = vmul.f32 %v1217_v5, %v1566_v56 }
 0x21b   :  { %674 = vadd.xlane.f32.xlu1 %v673_v6  ;;  %v631_v8 = vmul.f32 %v1219_v7, %v1569_v57 }
 0x21d   :  { %v1221_v63 = vpop.eup %1220  ;;  %v676_v9 = vadd.f32 %v631_v8, %v630_v43 }
 0x21e   :  { %v1223_v2 = vpop.eup %1222  ;;  %v632_v10 = vmul.f32 %v1221_v63, %v1566_v56 }
 0x21f   :  { %677 = vadd.xlane.f32.xlu0 %v676_v9  ;;  %v633_v11 = vmul.f32 %v1223_v2, %v1569_v57 }
 0x221   :  { %v679_v12 = vadd.f32 %v633_v11, %v632_v10 }
 0x223   :  { %680 = vadd.xlane.f32.xlu1 %v679_v12 }
 0x274   :  { %v636_v13 = vpop.xlane.xlu0 %635 }
 0x275   :  { %v683_v19 = vadd.f32 %v1632_v16, %v636_v13 }
 0x277   :  { %v971_v22 = vmul.f32 -1.442695, %v683_v19 }
 0x278   :  { %v639_v15 = vpop.xlane.xlu0 %638 }
 0x279   :  { %v684_v20 = vadd.f32 %v1632_v16, %v639_v15  ;;  %1224 = vpow2.f32 %v971_v22 }
 0x27b   :  { %v972_v24 = vmul.f32 -1.442695, %v684_v20  ;;  %v1650_v20 = vand.u32 127, %v71_v61 }
 0x27c   :  { %v642_v14 = vpop.xlane.xlu1 %641 }
 0x27d   :  { %v685_v21 = vadd.f32 %v1632_v16, %v642_v14  ;;  %1226 = vpow2.f32 %v972_v24  ;;  %v833_v22 = vadd.s32 4294967288, %v1650_v20  ;;  %v847_v61 = vadd.s32 4294967272, %v1650_v20 }
 0x27f   :  { %v973_v27 = vmul.f32 -1.442695, %v685_v21 }
 0x280   :  { %v645_v17 = vpop.xlane.xlu1 %644 }
 0x281   :  { %v686_v23 = vadd.f32 %v1632_v16, %v645_v17  ;;  %1228 = vpow2.f32 %v973_v27 }
 0x283   :  { %v974_v30 = vmul.f32 -1.442695, %v686_v23  ;;  %v1225_v0 = vpop.eup %1224 }
 0x284   :  { %v648_v18 = vpop.xlane.xlu0 %647  ;;  %v747_v52 = vadd.f32 1.0, %v1225_v0 }
 0x285   :  { %v687_v25 = vadd.f32 %v1632_v16, %v648_v18  ;;  %1230 = vpow2.f32 %v974_v30 }
 0x287   :  { %v975_v32 = vmul.f32 -1.442695, %v687_v25  ;;  %v1227_v48 = vpop.eup %1226 }
 0x288   :  { %v651_v56 = vpop.xlane.xlu1 %650  ;;  %v748_v54 = vadd.f32 1.0, %v1227_v48 }
 0x289   :  { %v688_v28 = vadd.f32 %v1632_v16, %v651_v56  ;;  %1232 = vpow2.f32 %v975_v32  ;;  %v831_v32 = vsub.s32 %v1650_v20, %v1498_v62 }
 0x28b   :  { %v976_v35 = vmul.f32 -1.442695, %v688_v28  ;;  %v1229_v50 = vpop.eup %1228 }
 0x28c   :  { %v654_v57 = vpop.xlane.xlu0 %653  ;;  %v749_v59 = vadd.f32 1.0, %v1229_v50 }
 0x28d   :  { %v689_v31 = vadd.f32 %v1632_v16, %v654_v57  ;;  %1234 = vpow2.f32 %v976_v35 }
 0x28f   :  { %v977_v38 = vmul.f32 -1.442695, %v689_v31  ;;  %v1231_v53 = vpop.eup %1230 }
 0x290   :  { %v657_v26 = vpop.xlane.xlu1 %656  ;;  %v750_v5 = vadd.f32 1.0, %v1231_v53 }
 0x291   :  { %v690_v33 = vadd.f32 %v1632_v16, %v657_v26  ;;  %1236 = vpow2.f32 %v977_v38  ;;  %v840_v26 = vadd.s32 4294967280, %v1650_v20 }
 0x293   :  { %v978_v40 = vmul.f32 -1.442695, %v690_v33  ;;  %v1233_v58 = vpop.eup %1232  ;;  %v836_v33 = vsub.s32 %v833_v22, %v1498_v62 }
 0x294   :  { %v660_v29 = vpop.xlane.xlu0 %659  ;;  %v751_v7 = vadd.f32 1.0, %v1233_v58 }
 0x295   :  { %v691_v36 = vadd.f32 %v1632_v16, %v660_v29  ;;  %1238 = vpow2.f32 %v978_v40  ;;  %v850_v40 = vsub.s32 %v847_v61, %v1498_v62  ;;  %v924_v61 = vadd.s32 4294967184, %v1650_v20 }
 0x297   :  { %v979_v42 = vmul.f32 -1.442695, %v691_v36  ;;  %v1235_v1 = vpop.eup %1234  ;;  %v843_v36 = vsub.s32 %v840_v26, %v1498_v62 }
 0x298   :  { %v663_v34 = vpop.xlane.xlu1 %662  ;;  %v752_v63 = vadd.f32 1.0, %v1235_v1 }
 0x299   :  { %v692_v39 = vadd.f32 %v1632_v16, %v663_v34  ;;  %1240 = vpow2.f32 %v979_v42  ;;  %v1661_v34 = vadd.s32 4294967256, %v1650_v20 }
 0x29b   :  { %v980_v44 = vmul.f32 -1.442695, %v692_v39  ;;  %v1237_v6 = vpop.eup %1236  ;;  %v864_v0 = vsub.s32 %v1661_v34, %v1498_v62 }
 0x29c   :  { %v666_v37 = vpop.xlane.xlu0 %665  ;;  %v753_v11 = vadd.f32 1.0, %v1237_v6 }
 0x29d   :  { %v693_v41 = vadd.f32 %v1632_v16, %v666_v37  ;;  %1242 = vpow2.f32 %v980_v44  ;;  %v1665_v37 = vadd.s32 4294967248, %v1650_v20  ;;  %v882_v44 = vadd.s32 4294967232, %v1650_v20 }
 0x29f   :  { %v981_v46 = vmul.f32 -1.442695, %v693_v41  ;;  %v1239_v8 = vpop.eup %1238  ;;  %v875_v41 = vadd.s32 4294967240, %v1650_v20  ;;  %v871_v50 = vsub.s32 %v1665_v37, %v1498_v62  ;;  %v885_v1 = vsub.s32 %v882_v44, %v1498_v62 }
 0x2a0   :  { %v669_v3 = vpop.xlane.xlu1 %668  ;;  %v754_v13 = vadd.f32 1.0, %v1239_v8 }
 0x2a1   :  { %v694_v45 = vadd.f32 %v1632_v16, %v669_v3  ;;  %1244 = vpow2.f32 %v981_v46  ;;  %v878_v58 = vsub.s32 %v875_v41, %v1498_v62 }
 0x2a3   :  { %v982_v47 = vmul.f32 -1.442695, %v694_v45  ;;  %v1241_v2 = vpop.eup %1240 }
 0x2a4   :  { %v672_v49 = vpop.xlane.xlu0 %671  ;;  %v755_v17 = vadd.f32 1.0, %v1241_v2 }
 0x2a5   :  { %v695_v51 = vadd.f32 %v1632_v16, %v672_v49  ;;  %1246 = vpow2.f32 %v982_v47  ;;  %v889_v47 = vadd.s32 4294967224, %v1650_v20 }
 0x2a7   :  { %v983_v55 = vmul.f32 -1.442695, %v695_v51  ;;  %v1243_v12 = vpop.eup %1242  ;;  %v896_v51 = vadd.s32 4294967216, %v1650_v20 }
 0x2a8   :  { %v675_v60 = vpop.xlane.xlu1 %674  ;;  %v756_v21 = vadd.f32 1.0, %v1243_v12 }
 0x2a9   :  { %1248 = vpow2.f32 %v983_v55  ;;  %v696_v4 = vadd.f32 %v1632_v16, %v675_v60  ;;  %v899_v2 = vsub.s32 %v896_v51, %v1498_v62 }
 0x2aa   :  { %1250 = vrcp.f32 %v747_v52 }
 0x2ab   :  { %1252 = vrcp.f32 %v748_v54  ;;  %v984_v43 = vmul.f32 -1.442695, %v696_v4  ;;  %v1245_v15 = vpop.eup %1244 }
 0x2ac   :  { %1254 = vrcp.f32 %v749_v59  ;;  %v678_v9 = vpop.xlane.xlu0 %677  ;;  %v757_v23 = vadd.f32 1.0, %v1245_v15  ;;  %v910_v15 = vadd.s32 4294967200, %v1650_v20 }
 0x2ad   :  { %1256 = vpow2.f32 %v984_v43  ;;  %v697_v10 = vadd.f32 %v1632_v16, %v678_v9  ;;  %v903_v43 = vadd.s32 4294967208, %v1650_v20 }
 0x2ae   :  { %1258 = vrcp.f32 %v750_v5 }
 0x2af   :  { %1260 = vrcp.f32 %v751_v7  ;;  %v985_v14 = vmul.f32 -1.442695, %v697_v10  ;;  %v1247_v19 = vpop.eup %1246  ;;  %v892_v7 = vsub.s32 %v889_v47, %v1498_v62 }
 0x2b0   :  { %1262 = vrcp.f32 %v752_v63  ;;  %v681_v18 = vpop.xlane.xlu1 %680  ;;  %v758_v27 = vadd.f32 1.0, %v1247_v19 }
 0x2b1   :  { %1264 = vpow2.f32 %v985_v14  ;;  %v698_v56 = vadd.f32 %v1632_v16, %v681_v18  ;;  %v854_v16 = vadd.s32 4294967264, %v1650_v20 }
 0x2b2   :  { %1266 = vrcp.f32 %v753_v11 }
 0x2b3   :  { %v1249_v57 = vpop.eup %1248  ;;  %1268 = vrcp.f32 %v754_v13  ;;  %v986_v24 = vmul.f32 -1.442695, %v698_v56  ;;  %v857_v3 = vsub.s32 %v854_v16, %v1498_v62  ;;  %v917_v56 = vadd.s32 4294967192, %v1650_v20 }
 0x2b4   :  { %v1251_v25 = vpop.eup %1250  ;;  %1270 = vrcp.f32 %v755_v17  ;;  %v759_v29 = vadd.f32 1.0, %v1249_v57 }
 0x2b5   :  { %v1253_v28 = vpop.eup %1252  ;;  %1272 = vpow2.f32 %v986_v24  ;;  %v795_v54 = vmul.f32 2.5, %v1251_v25  ;;  %v906_v24 = vsub.s32 %v903_v43, %v1498_v62 }
 0x2b6   :  { %v1255_v30 = vpop.eup %1254  ;;  %1274 = vrcp.f32 %v756_v21  ;;  %v796_v46 = vmul.f32 2.5, %v1253_v28 }
 0x2b7   :  { %v1257_v31 = vpop.eup %1256  ;;  %1276 = vrcp.f32 %v757_v23  ;;  %v797_v49 = vmul.f32 2.5, %v1255_v30  ;;  %v832_v12 = vrot.slane %v795_v54, %v831_v32 }
 0x2b8   :  { %v1259_v35 = vpop.eup %1258  ;;  %1278 = vrcp.f32 %v758_v27  ;;  %v760_v38 = vadd.f32 1.0, %v1257_v31  ;;  %v837_v5 = vrot.slane %v796_v46, %v836_v33  ;;  %v913_v31 = vsub.s32 %v910_v15, %v1498_v62 }
 0x2b9   :  { %v1261_v39 = vpop.eup %1260  ;;  %1280 = vrcp.f32 %v759_v29  ;;  %v798_v55 = vmul.f32 2.5, %v1259_v35  ;;  %v844_v63 = vrot.slane %v797_v49, %v843_v36  ;;  %v920_v35 = vsub.s32 %v917_v56, %v1498_v62 }
 0x2ba   :  { %v1263_v42 = vpop.eup %1262  ;;  %1282 = vrcp.f32 %v760_v38  ;;  %v799_v60 = vmul.f32 2.5, %v1261_v39  ;;  %v839_v57 = vsel %vm838_vm1, %v837_v5, %v832_v12  ;;  %v931_v39 = vadd.s32 4294967176, %v1650_v20 }
 0x2bb   :  { %v1265_v45 = vpop.eup %1264  ;;  %v800_v6 = vmul.f32 2.5, %v1263_v42  ;;  %v851_v13 = vrot.slane %v798_v55, %v850_v40  ;;  %v846_v26 = vsel %vm845_vm2, %v844_v63, %v839_v57 }
 0x2bc   :  { %v1267_v48 = vpop.eup %1266  ;;  %v761_v52 = vadd.f32 1.0, %v1265_v45  ;;  %v858_v18 = vrot.slane %v799_v60, %v857_v3  ;;  %v927_v3 = vsub.s32 %v924_v61, %v1498_v62  ;;  %v934_v20 = vsub.s32 %v931_v39, %v1498_v62 }
 0x2bd   :  { %v1269_v53 = vpop.eup %1268  ;;  %v801_v9 = vmul.f32 2.5, %v1267_v48  ;;  %v865_v22 = vrot.slane %v800_v6, %v864_v0  ;;  %v853_v29 = vsel %vm852_vm3, %v851_v13, %v846_v26 }
 0x2be   :  { %v1271_v59 = vpop.eup %1270  ;;  %1284 = vrcp.f32 %v761_v52  ;;  %v802_v14 = vmul.f32 2.5, %v1269_v53  ;;  %v860_v32 = vsel %vm859_vm4, %v858_v18, %v853_v29 }
 0x2bf   :  { %v1273_v4 = vpop.eup %1272  ;;  %v803_v19 = vmul.f32 2.5, %v1271_v59  ;;  %v872_v27 = vrot.slane %v801_v9, %v871_v50  ;;  %v867_v36 = vsel %vm866_vm5, %v865_v22, %v860_v32 }
 0x2c0   :  { %v1275_v8 = vpop.eup %1274  ;;  %v762_v10 = vadd.f32 1.0, %v1273_v4  ;;  %v879_v30 = vrot.slane %v802_v14, %v878_v58 }
 0x2c1   :  { %v1277_v11 = vpop.eup %1276  ;;  %v804_v23 = vmul.f32 2.5, %v1275_v8  ;;  %v886_v33 = vrot.slane %v803_v19, %v885_v1  ;;  %v874_v41 = vsel %vm873_vm6, %v872_v27, %v867_v36 }
 0x2c2   :  { %v1279_v17 = vpop.eup %1278  ;;  %1286 = vrcp.f32 %v762_v10  ;;  %v805_v28 = vmul.f32 2.5, %v1277_v11  ;;  %v881_v44 = vsel %vm880_vm7, %v879_v30, %v874_v41 }
 0x2c3   :  { %v1281_v21 = vpop.eup %1280  ;;  %v806_v16 = vmul.f32 2.5, %v1279_v17  ;;  %v893_v37 = vrot.slane %v804_v23, %v892_v7  ;;  %v888_v0 = vsel %vm887_vm8, %v886_v33, %v881_v44 }
 0x2c4   :  { %v1283_v25 = vpop.eup %1282  ;;  %v807_v34 = vmul.f32 2.5, %v1281_v21  ;;  %v900_v42 = vrot.slane %v805_v28, %v899_v2 }
 0x2c5   :  { %v808_v38 = vmul.f32 2.5, %v1283_v25  ;;  %v907_v45 = vrot.slane %v806_v16, %v906_v24  ;;  %v895_v48 = vsel %vm894_vm9, %v893_v37, %v888_v0 }
 0x2c6   :  { %v914_v47 = vrot.slane %v807_v34, %v913_v31  ;;  %v902_v51 = vsel %vm901_vm10, %v900_v42, %v895_v48 }
 0x2c7   :  { %v921_v49 = vrot.slane %v808_v38, %v920_v35  ;;  %v909_v54 = vsel %vm908_vm11, %v907_v45, %v902_v51 }
 0x2c8   :  { %v1285_v40 = vpop.eup %1284  ;;  %v916_v55 = vsel %vm915_vm12, %v914_v47, %v909_v54 }
 0x2c9   :  { %v809_v46 = vmul.f32 2.5, %v1285_v40  ;;  %v923_v58 = vsel %vm922_vm13, %v921_v49, %v916_v55 }
 0x2cb   :  { %v928_v52 = vrot.slane %v809_v46, %v927_v3 }
 0x2cc   :  { %v1287_v50 = vpop.eup %1286 }
 0x2cd   :  { %v810_v53 = vmul.f32 2.5, %v1287_v50  ;;  %v930_v60 = vsel %vm929_vm14, %v928_v52, %v923_v58 }
 0x2cf   :  { %v935_v59 = vrot.slane %v810_v53, %v934_v20 }
 0x2d1   :  { %v937_v1 = vsel %vm936_vm15, %v935_v59, %v930_v60 }
 0x2d2   :  { %939 = vst [vmem:[#allocation6] sm:$0x1] %v937_v1 }
 0x2d3   :  { %1321 = shalt.err (!%p1318_p12)
}
 0x2d4   :  { %s1322_s3 = scalar_lea.hbm %s1718_s7, 16 }
 0x2d5   :  { %p1323_p13 = scmp.ne.s32.totalorder %s1718_s7, %s1322_s3  ;;  %p1326_p0 = scmp.lt.u32.totalorder %s1322_s3, %s1718_s7 }
 0x2d7   :  { %p1328_p1 = pnand %p1326_p0, %p1323_p13 }
 0x2d9   :  { %1331 = shalt.err (!%p1328_p1)
}
 0x2da   :  { %949 = dma.vmem_to_hbm [thread:$0]  %s947_s17, 16, %s1718_s7, [#allocation5]  }
 0x2db   :  { %1334 = dma.done.wait [#allocation5], 16  }
 0x2dc   :  { %1335 = vsyncadd [#allocation5], 4294967280 }
 0x2dd   :  { %953 = vsyncpa [#allocation4], 1 }
 0x2de   :  { %954 = vsyncpa [#allocation5], 1 }

</bundles_post_ra>
